<compile_context>
chip_gen: v7x
topology: tpu7x:2x2x1
jax: 0.10.0
libtpu: 0.0.40
codegen_flags: <defaults>
</compile_context>

<pallas_src>
import jax
import jax.numpy as jnp
from jax.experimental import pallas as pl
from jax.experimental.pallas import tpu as pltpu

# ---- problem sizes (small, consistent with the module's forward) ------------
C_IN, C_OUT = 4, 8
H, W = 16, 16
HW = H * W                      # 256 -> lane axis
K_IM2COL = 9 * C_IN             # 36  -> matmul contraction dim
N_CLASSES = 10
THRESHOLD = 0.9
BATCH = 2


# ---- Pallas kernel: im2col-conv + ReLU + (pool -> FC) + confidence ----------
def _segmented_kernel(patches_ref, wconv_ref, bconv_ref, wfc_ref, bfc_ref,
                      feat_ref, logits_ref, conf_ref):
    # patches_ref : (36, 256)      im2col of the padded sample, rows=(dh,dw,ci)
    # wconv_ref   : (C_OUT, 36)    conv weight, columns in the same order
    # bconv_ref   : (C_OUT, 1)
    # wfc_ref     : (N_CLASSES, C_OUT)
    # bfc_ref     : (N_CLASSES, 1)
    # feat_ref    : (C_OUT, 256)   network output after ReLU (lane-dense)
    # logits_ref  : (N_CLASSES, 1) early-exit logits
    # conf_ref    : (1, 1)         max softmax confidence

    # Conv2d(3x3, padding=1) + bias + ReLU as ONE MXU matmul:
    #   (8, 36) @ (36, 256) -> (8, 256); channels on sublanes, H*W on lanes.
    feat = jnp.dot(wconv_ref[...], patches_ref[...],
                   preferred_element_type=jnp.float32) + bconv_ref[...]
    feat = jnp.maximum(feat, 0.0)                              # ReLU
    feat_ref[...] = feat                                       # unmasked, lane-dense store

    # Exit head: global average pool first (XLU lane-reduce), then the tiny FC
    # matmul on the MXU:  (10, 8) @ (8, 1) + bias.
    pooled = jnp.sum(feat, axis=-1, keepdims=True) * (1.0 / HW)   # (C_OUT, 1)
    logits = jnp.dot(wfc_ref[...], pooled,
                     preferred_element_type=jnp.float32) + bfc_ref[...]  # (10, 1)
    logits_ref[...] = logits

    # confidence.max() for Softmax(dim=0):  max(softmax(x)) == 1/sum(exp(x-max))
    m = jnp.max(logits, axis=0, keepdims=True)                 # (1, 1)
    s = jnp.sum(jnp.exp(logits - m), axis=0, keepdims=True)    # (1, 1)
    conf_ref[...] = pl.reciprocal(s, approx=True)              # EUP slot


# ---- wrapper ----------------------------------------------------------------
def segmented_early_exit_forward(x_bchw, params):
    """x_bchw: (B, C_IN, H, W) float32.  Each row is one un-batched sample
    (the PyTorch module's `x`); the batch axis only amortizes kernel launch."""
    wconv, bconv, wfc, bfc = params
    B = x_bchw.shape[0]

    # Channel-major, lane-dense im2col (done once in XLA, ~36 KB/sample):
    #   patches[b, (dh*3+dw)*C_IN + ci, h*W + w] = xpad[b, ci, h+dh, w+dw]
    xpad = jnp.pad(x_bchw, ((0, 0), (0, 0), (1, 1), (1, 1)))
    shifts = [xpad[:, :, dh:dh + H, dw:dw + W].reshape(B, C_IN, HW)
              for dh in range(3) for dw in range(3)]
    patches = jnp.concatenate(shifts, axis=1)                  # (B, 36, 256)

    # Kernel-side weight layouts (match the patch row order).
    wconv2d = jnp.transpose(wconv, (3, 0, 1, 2)).reshape(C_OUT, K_IM2COL)
    bconv_c = bconv.reshape(C_OUT, 1)
    wfc_t = wfc.T                                              # (N_CLASSES, C_OUT)
    bfc_c = bfc.reshape(N_CLASSES, 1)

    feat, logits, conf = pl.pallas_call(
        _segmented_kernel,
        grid=(B,),
        out_shape=(
            jax.ShapeDtypeStruct((B, C_OUT, HW), jnp.float32),
            jax.ShapeDtypeStruct((B, N_CLASSES, 1), jnp.float32),
            jax.ShapeDtypeStruct((B, 1, 1), jnp.float32),
        ),
        in_specs=[
            pl.BlockSpec((None, K_IM2COL, HW), lambda b: (b, 0, 0)),
            pl.BlockSpec((C_OUT, K_IM2COL), lambda b: (0, 0)),
            pl.BlockSpec((C_OUT, 1), lambda b: (0, 0)),
            pl.BlockSpec((N_CLASSES, C_OUT), lambda b: (0, 0)),
            pl.BlockSpec((N_CLASSES, 1), lambda b: (0, 0)),
        ],
        out_specs=(
            pl.BlockSpec((None, C_OUT, HW), lambda b: (b, 0, 0)),
            pl.BlockSpec((None, N_CLASSES, 1), lambda b: (b, 0, 0)),
            pl.BlockSpec((None, 1, 1), lambda b: (b, 0, 0)),
        ),
        compiler_params=pltpu.CompilerParams(
            dimension_semantics=("parallel",)),   # v7x: split batch across TCs
    )(patches, wconv2d, bconv_c, wfc_t, bfc_c)

    early_exit = logits[:, :, 0]                    # (B, N_CLASSES)  .squeeze(0)
    features = feat.reshape(B, C_OUT, H, W)         # free row-major reshape (CHW)
    conf_max = conf[:, 0, 0]                        # (B,)
    take_exit = conf_max > THRESHOLD                # (B,) bool (module's branch cond)
    return early_exit, features, take_exit, conf_max


# ---- pure-JAX reference (independent path, for correctness check) -----------
def reference_forward(x_bchw, params):
    wconv, bconv, wfc, bfc = params
    feat = jax.lax.conv_general_dilated(
        x_bchw, wconv, window_strides=(1, 1), padding="SAME",
        dimension_numbers=("NCHW", "HWIO", "NCHW"))
    feat = jnp.maximum(feat + bconv.reshape(1, C_OUT, 1, 1), 0.0)
    pooled = feat.mean(axis=(2, 3))                           # (B, C_OUT)
    logits = pooled @ wfc + bfc                               # (B, N_CLASSES)
    conf = jax.nn.softmax(logits, axis=-1).max(axis=-1)       # (B,)
    return logits, feat, conf > THRESHOLD, conf


# ---- deterministic parameter init -------------------------------------------
def init_params(key):
    k1, k2, k3, k4 = jax.random.split(key, 4)
    wconv = jax.random.normal(k1, (3, 3, C_IN, C_OUT), jnp.float32) * 0.1
    bconv = jax.random.normal(k2, (C_OUT,), jnp.float32) * 0.1
    wfc = jax.random.normal(k3, (C_OUT, N_CLASSES), jnp.float32) * 0.1
    bfc = jax.random.normal(k4, (N_CLASSES,), jnp.float32) * 0.1
    return wconv, bconv, wfc, bfc


if __name__ == "__main__":
    key = jax.random.PRNGKey(0)
    k_x, k_p = jax.random.split(key)
    x = jax.random.normal(k_x, (BATCH, C_IN, H, W), jnp.float32)
    params = init_params(k_p)

    fwd = jax.jit(segmented_early_exit_forward)
    early_exit, features, take_exit, conf_max = fwd(x, params)
    jax.block_until_ready((early_exit, features, take_exit, conf_max))

    assert early_exit.shape == (BATCH, N_CLASSES)
    assert features.shape == (BATCH, C_OUT, H, W)
    assert take_exit.shape == (BATCH,)

    # correctness vs. independent pure-JAX reference
    ref_logits, ref_feat, ref_flag, ref_conf = reference_forward(x, params)
    assert jnp.allclose(early_exit, ref_logits, atol=2e-2, rtol=2e-2)
    assert jnp.allclose(features, ref_feat, atol=2e-2, rtol=2e-2)
    assert jnp.allclose(conf_max, ref_conf, atol=2e-2, rtol=2e-2)
    assert bool(jnp.all(take_exit == ref_flag))

    print("KERNEL_OK")
</pallas_src>

<mosaic_0001>
module attributes {stable_mosaic.version = 11 : i64} {
  func.func @_segmented_kernel(%arg0: i32, %arg1: memref<1x36x256xf32, #tpu.memory_space<vmem>>, %arg2: memref<8x36xf32, #tpu.memory_space<vmem>>, %arg3: memref<8x1xf32, #tpu.memory_space<vmem>>, %arg4: memref<10x8xf32, #tpu.memory_space<vmem>>, %arg5: memref<10x1xf32, #tpu.memory_space<vmem>>, %arg6: memref<1x8x256xf32, #tpu.memory_space<vmem>>, %arg7: memref<1x10x1xf32, #tpu.memory_space<vmem>>, %arg8: memref<1x1x1xf32, #tpu.memory_space<vmem>>) attributes {dimension_semantics = [#tpu.dimension_semantics<parallel>], iteration_bounds = array<i64: 2>, scalar_prefetch = 0 : i64, scratch_operands = 0 : i64, tpu.core_type = #tpu.core_type<tc>, window_params = [{transform_indices = @transform_0, window_bounds = array<i64: 1, 36, 256>}, {pipeline_mode = #tpu.pipeline_mode<synchronous>, transform_indices = @transform_1, window_bounds = array<i64: 8, 36>}, {pipeline_mode = #tpu.pipeline_mode<synchronous>, transform_indices = @transform_2, window_bounds = array<i64: 8, 1>}, {pipeline_mode = #tpu.pipeline_mode<synchronous>, transform_indices = @transform_3, window_bounds = array<i64: 10, 8>}, {pipeline_mode = #tpu.pipeline_mode<synchronous>, transform_indices = @transform_4, window_bounds = array<i64: 10, 1>}, {transform_indices = @transform_5, window_bounds = array<i64: 1, 8, 256>}, {transform_indices = @transform_6, window_bounds = array<i64: 1, 10, 1>}, {transform_indices = @transform_7, window_bounds = array<i64: 1, 1, 1>}]} {
    %c0 = arith.constant 0 : index
    %c0_0 = arith.constant 0 : index
    %0 = vector.load %arg2[%c0, %c0_0] : memref<8x36xf32, #tpu.memory_space<vmem>>, vector<8x36xf32>
    %c0_1 = arith.constant 0 : index
    %c0_2 = arith.constant 0 : index
    %c0_3 = arith.constant 0 : index
    %1 = vector.load %arg1[%c0_1, %c0_2, %c0_3] : memref<1x36x256xf32, #tpu.memory_space<vmem>>, vector<1x36x256xf32>
    %2 = vector.shape_cast %1 : vector<1x36x256xf32> to vector<36x256xf32>
    %cst = arith.constant dense<0.000000e+00> : vector<8x256xf32>
    %3 = tpu.matmul %0, %2, %cst {dimension_numbers = #tpu.dot_dimension_numbers<[1], [0], [0], [1], [0, 0, 1, 1], [], []>} : vector<8x36xf32>, vector<36x256xf32>, vector<8x256xf32> -> vector<8x256xf32>
    %c0_4 = arith.constant 0 : index
    %c0_5 = arith.constant 0 : index
    %4 = vector.load %arg3[%c0_4, %c0_5] : memref<8x1xf32, #tpu.memory_space<vmem>>, vector<8x1xf32>
    %5 = vector.broadcast %4 : vector<8x1xf32> to vector<8x256xf32>
    %6 = arith.addf %3, %5 : vector<8x256xf32>
    %cst_6 = arith.constant 0.000000e+00 : f32
    %7 = vector.broadcast %cst_6 : f32 to vector<8x256xf32>
    %8 = arith.maximumf %6, %7 : vector<8x256xf32>
    %c0_7 = arith.constant 0 : index
    %c0_8 = arith.constant 0 : index
    %c0_9 = arith.constant 0 : index
    %9 = vector.load %arg6[%c0_7, %c0_8, %c0_9] : memref<1x8x256xf32, #tpu.memory_space<vmem>>, vector<1x8x256xf32>
    %10 = vector.shape_cast %9 : vector<1x8x256xf32> to vector<8x256xf32>
    %11 = vector.shape_cast %8 : vector<8x256xf32> to vector<1x8x256xf32>
    tpu.vector_store %arg6[%c0_7, %c0_8, %c0_9], %11 {strides = array<i32>} : memref<1x8x256xf32, #tpu.memory_space<vmem>>, vector<1x8x256xf32>,
    %cst_10 = arith.constant dense<0.000000e+00> : vector<8xf32>
    %12 = vector.multi_reduction <add>, %8, %cst_10 [1] : vector<8x256xf32> to vector<8xf32>
    %13 = vector.shape_cast %12 : vector<8xf32> to vector<8x1xf32>
    %cst_11 = arith.constant 3.906250e-03 : f32
    %14 = vector.broadcast %cst_11 : f32 to vector<8x1xf32>
    %15 = arith.mulf %13, %14 : vector<8x1xf32>
    %c0_12 = arith.constant 0 : index
    %c0_13 = arith.constant 0 : index
    %16 = vector.load %arg4[%c0_12, %c0_13] : memref<10x8xf32, #tpu.memory_space<vmem>>, vector<10x8xf32>
    %cst_14 = arith.constant dense<0.000000e+00> : vector<10x1xf32>
    %17 = tpu.matmul %16, %15, %cst_14 {dimension_numbers = #tpu.dot_dimension_numbers<[1], [0], [0], [1], [0, 0, 1, 1], [], []>} : vector<10x8xf32>, vector<8x1xf32>, vector<10x1xf32> -> vector<10x1xf32>
    %c0_15 = arith.constant 0 : index
    %c0_16 = arith.constant 0 : index
    %18 = vector.load %arg5[%c0_15, %c0_16] : memref<10x1xf32, #tpu.memory_space<vmem>>, vector<10x1xf32>
    %19 = arith.addf %17, %18 : vector<10x1xf32>
    %c0_17 = arith.constant 0 : index
    %c0_18 = arith.constant 0 : index
    %c0_19 = arith.constant 0 : index
    %20 = vector.load %arg7[%c0_17, %c0_18, %c0_19] : memref<1x10x1xf32, #tpu.memory_space<vmem>>, vector<1x10x1xf32>
    %21 = vector.shape_cast %20 : vector<1x10x1xf32> to vector<10x1xf32>
    %22 = vector.shape_cast %19 : vector<10x1xf32> to vector<1x10x1xf32>
    tpu.vector_store %arg7[%c0_17, %c0_18, %c0_19], %22 {strides = array<i32>} : memref<1x10x1xf32, #tpu.memory_space<vmem>>, vector<1x10x1xf32>,
    %cst_20 = arith.constant dense<0xFF800000> : vector<1xf32>
    %23 = vector.multi_reduction <maximumf>, %19, %cst_20 [0] : vector<10x1xf32> to vector<1xf32>
    %24 = vector.shape_cast %23 : vector<1xf32> to vector<1x1xf32>
    %25 = vector.broadcast %24 : vector<1x1xf32> to vector<10x1xf32>
    %26 = arith.subf %19, %25 : vector<10x1xf32>
    %27 = math.exp %26 : vector<10x1xf32>
    %cst_21 = arith.constant dense<0.000000e+00> : vector<1xf32>
    %28 = vector.multi_reduction <add>, %27, %cst_21 [0] : vector<10x1xf32> to vector<1xf32>
    %29 = vector.shape_cast %28 : vector<1xf32> to vector<1x1xf32>
    %30 = tpu.reciprocal %29 {approx = true} : vector<1x1xf32> -> vector<1x1xf32>
    %c0_22 = arith.constant 0 : index
    %c0_23 = arith.constant 0 : index
    %c0_24 = arith.constant 0 : index
    %31 = vector.load %arg8[%c0_22, %c0_23, %c0_24] : memref<1x1x1xf32, #tpu.memory_space<vmem>>, vector<1x1x1xf32>
    %32 = vector.shape_cast %31 : vector<1x1x1xf32> to vector<1x1xf32>
    %33 = vector.shape_cast %30 : vector<1x1xf32> to vector<1x1x1xf32>
    tpu.vector_store %arg8[%c0_22, %c0_23, %c0_24], %33 {strides = array<i32>} : memref<1x1x1xf32, #tpu.memory_space<vmem>>, vector<1x1x1xf32>,
    return
  }
  func.func @transform_0(%arg0: i32) -> (i32, i32, i32) {
    %c0_i32 = arith.constant 0 : i32
    %c0_i32_0 = arith.constant 0 : i32
    %c0_i32_1 = arith.constant 0 : i32
    return %arg0, %c0_i32, %c0_i32_0 : i32, i32, i32
  }
  func.func @transform_1(%arg0: i32) -> (i32, i32) {
    %c0_i32 = arith.constant 0 : i32
    %c0_i32_0 = arith.constant 0 : i32
    %c0_i32_1 = arith.constant 0 : i32
    return %c0_i32, %c0_i32_0 : i32, i32
  }
  func.func @transform_2(%arg0: i32) -> (i32, i32) {
    %c0_i32 = arith.constant 0 : i32
    %c0_i32_0 = arith.constant 0 : i32
    %c0_i32_1 = arith.constant 0 : i32
    return %c0_i32, %c0_i32_0 : i32, i32
  }
  func.func @transform_3(%arg0: i32) -> (i32, i32) {
    %c0_i32 = arith.constant 0 : i32
    %c0_i32_0 = arith.constant 0 : i32
    %c0_i32_1 = arith.constant 0 : i32
    return %c0_i32, %c0_i32_0 : i32, i32
  }
  func.func @transform_4(%arg0: i32) -> (i32, i32) {
    %c0_i32 = arith.constant 0 : i32
    %c0_i32_0 = arith.constant 0 : i32
    %c0_i32_1 = arith.constant 0 : i32
    return %c0_i32, %c0_i32_0 : i32, i32
  }
  func.func @transform_5(%arg0: i32) -> (i32, i32, i32) {
    %c0_i32 = arith.constant 0 : i32
    %c0_i32_0 = arith.constant 0 : i32
    %c0_i32_1 = arith.constant 0 : i32
    return %arg0, %c0_i32, %c0_i32_0 : i32, i32, i32
  }
  func.func @transform_6(%arg0: i32) -> (i32, i32, i32) {
    %c0_i32 = arith.constant 0 : i32
    %c0_i32_0 = arith.constant 0 : i32
    %c0_i32_1 = arith.constant 0 : i32
    return %arg0, %c0_i32, %c0_i32_0 : i32, i32, i32
  }
  func.func @transform_7(%arg0: i32) -> (i32, i32, i32) {
    %c0_i32 = arith.constant 0 : i32
    %c0_i32_0 = arith.constant 0 : i32
    %c0_i32_1 = arith.constant 0 : i32
    return %arg0, %c0_i32, %c0_i32_0 : i32, i32, i32
  }
}

</mosaic_0001>

<bundles_post_ra>
// kernel: segmented_early_exit_forward.1
= control target key start
LH: loop header
LB: loop body
LE: loop exit
PB: predicated region body
PF: predicated region fallthrough
CT: control target
= control target key end

     0   :  { %s740_s24 = smov 0   ;;  %s792_s0 = inlined_call_operand.vmem [shape: f32[2,36,256], index: 0, kind: input, shape index: {}]   ;;  %s793_s1 = inlined_call_operand.vmem [shape: f32[8,36], index: 1, kind: input, shape index: {}]   ;;  %s794_s2 = inlined_call_operand.vmem [shape: f32[8,1], index: 2, kind: input, shape index: {}]   ;;  %s795_s3 = inlined_call_operand.vmem [shape: f32[10,8], index: 3, kind: input, shape index: {}]   ;;  %s796_s4 = inlined_call_operand.vmem [shape: f32[10,1], index: 4, kind: input, shape index: {}]   ;;  %s797_s5 = inlined_call_operand.vmem [shape: f32[2,8,256], index: 5, kind: output, shape index: {0}]   ;;  %s798_s6 = inlined_call_operand.vmem [shape: f32[2,10,1], index: 6, kind: output, shape index: {1}]   ;;  %s799_s7 = inlined_call_operand.vmem [shape: f32[2,1,1], index: 7, kind: output, shape index: {2}]  }
   0x1 LB: > { %s637_s25 = sadd.s32 4294967295, %s696_s24   ;;  %p641_p0 = scmp.ge.s32.totalorder %s696_s24, 1  ;;  %s696_s24 = sphi %s740_s24, %s18_s24  }
   0x2   : > { %p242_p1 = scmp.lt.s32.totalorder %s696_s24, 3 }
   0x4   : > { %p243_p2 = pnand %p641_p0, %p242_p1 }
   0x5   : > { %p282_p3 = scmp.lt.s32.totalorder (!%p243_p2), %s637_s25, 1  ;;  %v698_v0 = vmov (!%p243_p2), 0.0   ;;  %v699_v1 = vmov (!%p243_p2), 0   ;;  %v311_v2 = vld [vmem:[%s794_s2] sm:$0xff] (!%p243_p2)  ;;  %vm321_vm0 = vcmask (!%p243_p2), 1043456   ;;  %vm317_vm1 = vcmask (!%p243_p2), 293888  }
   0x6   : > { %246 = sbr.rel (%p243_p2) target bundleno = 668 (0x29c), region = 40  ;;  %392 = vmatprep.mubr.f32.mxu0 (!%p243_p2), %v698_v0  ;;  %683 = vset.pattern.permute.xlu0 (!%p243_p2), %v699_v1  ;;  %v300_v17 = vld [vmem:[%s793_s1] sm:$0xff] (!%p243_p2)  ;;  %vm411_vm2 = vcmask (!%p243_p2), 64512   ;;  %v408_v29 = vld [vmem:[%s795_s3 + $0x8] sm:$0x3] (!%p243_p2)  ;;  %vm495_vm3 = vcmask (!%p243_p2), 1024  }
   0x7   : > { %314 = vperm.xlu0 (!%p243_p2), %683, %v311_v2   ;;  %v407_v26 = vld [vmem:[%s795_s3] sm:$0xff] (!%p243_p2)  ;;  %v410_v30 = vld [vmem:[%s796_s4 + $0x8] sm:$0x3] (!%p243_p2)  ;;  %vm493_vm4 = vcmask (!%p243_p2), 7168   ;;  %vm522_vm5 = vcmask (!%p243_p2), 0  }
   0x8   : > { %661 = vmatprep.mubr.msk.f32.mxu1 (!%p243_p2), %vm411_vm2, %v407_v26  ;;  %v409_v31 = vld [vmem:[%s796_s4] sm:$0xff] (!%p243_p2) }
   0xd   : > { %s801_s25 = smov (!%p282_p3, %s637_s25), 1 }
   0xe   : > { %s672_s28 = smul.u32 80, %s801_s25  ;;  %s654_s11 = sshll.u32 %s801_s25, 4 }
   0xf   : > { %s291_s14 = scalar_lea.vmem %s797_s5, %s654_s11  ;;  %s296_s27 = scalar_lea.vmem %s798_s6, %s654_s11 }
  0x10   : > { %s286_s8 = scalar_lea.vmem %s792_s0, %s672_s28  ;;  %s299_s30 = scalar_lea.vmem %s799_s7, %s801_s25 }
  0x11   : > { %v302_v3 = vld [vmem:[%s286_s8 + $0x8] sm:$0xff]  ;;  %v304_v4 = vld [vmem:[%s286_s8 + $0x18] sm:$0xff]  ;;  %v301_v5 = vld [vmem:[%s286_s8] sm:$0xff] }
  0x12   : > { %v664_v6 = vpack.c.bf16 %v304_v4, %v302_v3  ;;  %v303_v7 = vld [vmem:[%s286_s8 + $0x10] sm:$0xff]  ;;  %v306_v8 = vld [vmem:[%s286_s8 + $0x28] sm:$0xff]  ;;  %v308_v9 = vld [vmem:[%s286_s8 + $0x38] sm:$0xff] }
  0x13   : > { %v666_v10 = vpack.c.bf16 %v303_v7, %v301_v5  ;;  %v668_v11 = vpack.c.bf16 %v308_v9, %v306_v8  ;;  %v305_v12 = vld [vmem:[%s286_s8 + $0x20] sm:$0xff]  ;;  %v307_v13 = vld [vmem:[%s286_s8 + $0x30] sm:$0xff]  ;;  %v310_v15 = vld [vmem:[%s286_s8 + $0x48] sm:$0xf] }
  0x14   : > { %665 = vmatprep.subr.bf16.mxu0 %v664_v6  ;;  %v670_v14 = vpack.c.bf16 %v307_v13, %v305_v12  ;;  %v309_v16 = vld [vmem:[%s286_s8 + $0x40] sm:$0xf] }
  0x15   : > { %667 = vmatpush1.bf16.msra.mxu0 %v666_v10 }
  0x16   : > { %669 = vmatprep.subr.bf16.mxu0 %v668_v11 }
  0x19   : > { %671 = vmatpush1.bf16.msra.mxu0 %v670_v14 }
  0x1a   : > { %647 = vmatprep.subr.msk.mxu0 %vm321_vm0, %v310_v15 }
  0x1d   : > { %648 = vmatpush1.msk.msra.mxu0 %vm321_vm0, %v309_v16 }
  0x1e   : > { %649 = vmatmul.mubr.msk.f32.vlgmr.msra.gmra.mrb[0].mxu0 %vm317_vm1, %v300_v17 }
  0x86   : > { %v315_v18 = vpop.permute.xlu0 %314 }
  0xf1   : > { %v394_v19 = vpop.f32.mrb[0].mxu0 }
  0xf2   : > { %v395_v20 = vadd.f32 %v394_v19, %v315_v18  ;;  %v396_v21 = vpop.f32.mrb[1].mxu0 }
  0xf3   : > { %v397_v22 = vadd.f32 %v396_v21, %v315_v18 }
  0xf4   : > { %v399_v23 = vmax.f32 %v395_v20, 0.0 }
  0xf5   : > { %v400_v24 = vmax.f32 %v397_v22, 0.0 }
  0xf6   : > { %401 = vst [vmem:[%s291_s14] sm:$0xff] %v399_v23 }
  0xf7   : > { %402 = vst [vmem:[%s291_s14 + $0x8] sm:$0xff] %v400_v24  ;;  %v403_v25 = vadd.f32 %v400_v24, %v399_v23 }
  0xf9   : > { %404 = vadd.xlane.f32.xlu0 %v403_v25 }
 0x186   : > { %v405_v27 = vpop.xlane.xlu0 %404 }
 0x187   : > { %v406_v28 = vmul.f32 0.00390625, %v405_v27 }
 0x189   : > { %659 = vmatprep.subr.mxu1 %v406_v28 }
 0x18a   : > { %660 = vmatpush3.msra.mxu1 %v406_v28 }
 0x18b   : > { %662 = vmatmul.mubr.msk.f32.vlgmr.msra.gmra.mrb[0].mxu1 %vm411_vm2, %v408_v29 }
 0x25e   : > { %v663_v32 = vpop.f32.mrb[0].mxu1 }
 0x25f   : > { %v490_v33 = vadd.f32 %v663_v32, %v410_v30  ;;  %v484_v34 = vpop.f32.mrb[1].mxu1 }
 0x260   : > { %v485_v35 = vadd.f32 %v484_v34, %v409_v31 }
 0x261   : > { %496 = vst.msk [vmem:[%s296_s27 + $0x8] sm:$0x3] %vm495_vm3, %v490_v33  ;;  %v498_v36 = vsel %vm495_vm3, %v490_v33, -inf }
 0x262   : > { %494 = vst.msk [vmem:[%s296_s27] sm:$0xff] %vm493_vm4, %v485_v35  ;;  %v497_v37 = vsel %vm493_vm4, %v485_v35, -inf }
 0x263   : > { %v499_v38 = vmax.f32 %v497_v37, %v498_v36 }
 0x265   : > { %v500_v39 = vrot.slane %v499_v38, 4 }
 0x267   : > { %v501_v40 = vmax.f32 %v499_v38, %v500_v39 }
 0x269   : > { %v502_v41 = vrot.slane %v501_v40, 2 }
 0x26b   : > { %v503_v42 = vmax.f32 %v501_v40, %v502_v41 }
 0x26d   : > { %v504_v43 = vrot.slane %v503_v42, 1 }
 0x26f   : > { %v505_v44 = vmax.f32 %v503_v42, %v504_v43 }
 0x271   : > { %v506_v45 = vsub.f32 %v485_v35, %v505_v44  ;;  %v507_v46 = vsub.f32 %v490_v33, %v505_v44 }
 0x273   : > { %v508_v47 = vmul.f32 1.442695, %v506_v45  ;;  %v510_v48 = vmul.f32 1.442695, %v507_v46 }
 0x275   : > { %684 = vpow2.f32 %v508_v47 }
 0x276   : > { %686 = vpow2.f32 %v510_v48 }
 0x27f   : > { %v685_v49 = vpop.eup %684 }
 0x280   : > { %v687_v50 = vpop.eup %686  ;;  %v512_v51 = vsel %vm493_vm4, %v685_v49, 0.0 }
 0x281   : > { %v513_v52 = vsel %vm495_vm3, %v687_v50, 0.0 }
 0x282   : > { %v514_v53 = vadd.f32 %v513_v52, %v512_v51 }
 0x284   : > { %v515_v54 = vrot.slane %v514_v53, 4 }
 0x286   : > { %v516_v55 = vadd.f32 %v515_v54, %v514_v53 }
 0x288   : > { %v517_v56 = vrot.slane %v516_v55, 2 }
 0x28a   : > { %v518_v57 = vadd.f32 %v517_v56, %v516_v55 }
 0x28c   : > { %v519_v58 = vrot.slane %v518_v57, 1 }
 0x28e   : > { %v520_v59 = vadd.f32 %v519_v58, %v518_v57 }
 0x290   : > { %688 = vrcp.f32 %v520_v59 }
 0x29a   : > { %v689_v60 = vpop.eup %688 }
 0x29b   : > { %523 = vst.msk [vmem:[%s299_s30] sm:$0x1] %vm522_vm5, %v689_v60 }
 0x29c PF: > { %s18_s24 = sadd.s32 1, %s696_s24  }
 0x29d   : > { %p15_p4 = scmp.ge.s32.totalorder %s18_s24, 4  }
 0x29f   :  { %17 = sbr.rel (!%p15_p4) target bundleno = 1 (0x1), region = 94 }

</bundles_post_ra>
